<compile_context>
chip_gen: v5e
topology: v5e:2x2
jax: 0.10.0
libtpu: 0.0.40
codegen_flags: <defaults>
</compile_context>

<pallas_src>
import functools

import jax
import jax.numpy as jnp
from jax.experimental import pallas as pl
from jax.experimental.pallas import tpu as pltpu


def _smart_average_kernel(alpha_ref, x_ref, o_ref, *, inv_hw, add_residual):
    # alpha_ref: SMEM (1,)          scalar blend parameter
    # x_ref    : VMEM (TILE_R, HWp) tile of the flattened (possibly padded) input
    x = x_ref[...].astype(jnp.float32)
    # Lane padding (if any) is zero, so summing the full padded row and
    # dividing by the *true* HW gives the correct spatial mean.
    mean = jnp.sum(x, axis=-1, keepdims=True) * inv_hw
    alpha = alpha_ref[0]
    y = mean + alpha * (x - mean)          # == alpha*x + (1-alpha)*mean
    if add_residual:                       # fused residual for layers[1:]
        y = x + y
    o_ref[...] = y.astype(o_ref.dtype)


# Conservative VMEM budget for the 4 live buffers (double-buffered in + out):
# fits comfortably inside v5e's 16 MiB default scoped limit and v7x's VMEM.
_VMEM_BUDGET_BYTES = 8 * 1024 * 1024
_MAX_TILE_R = 2048


def smart_average_layer(x_nchw: jax.Array, alpha: jax.Array,
                        add_residual: bool = False) -> jax.Array:
    """One SmartAverageLayer: mean + alpha*(x - mean), optional fused +x."""
    N, C, H, W = x_nchw.shape
    R, HW = N * C, H * W
    x2d = x_nchw.reshape(R, HW)

    # --- Lane padding: keep the last dim a multiple of 128 (lane-dense stores).
    HW_pad = max(128, ((HW + 127) // 128) * 128)
    if HW_pad != HW:
        x2d = jnp.pad(x2d, ((0, 0), (0, HW_pad - HW)))

    # --- Row tiling: multiple of 8, sized to the VMEM budget, capped.
    itemsize = jnp.dtype(x2d.dtype).itemsize
    bytes_per_row = HW_pad * itemsize
    max_rows = max(8, _VMEM_BUDGET_BYTES // (4 * bytes_per_row))
    R_pad8 = ((R + 7) // 8) * 8
    TILE_R = min(_MAX_TILE_R, (max_rows // 8) * 8, R_pad8)
    TILE_R = max(8, TILE_R)

    n_tiles = pl.cdiv(R_pad8, TILE_R)
    R_final = n_tiles * TILE_R
    if R_final != R:
        x2d = jnp.pad(x2d, ((0, R_final - R), (0, 0)))

    kernel = functools.partial(
        _smart_average_kernel,
        inv_hw=1.0 / float(HW),
        add_residual=add_residual,
    )

    out2d = pl.pallas_call(
        kernel,
        out_shape=jax.ShapeDtypeStruct((R_final, HW_pad), x2d.dtype),
        grid_spec=pl.GridSpec(
            grid=(n_tiles,),
            in_specs=[
                pl.BlockSpec(memory_space=pltpu.MemorySpace.SMEM),      # alpha
                pl.BlockSpec((TILE_R, HW_pad), lambda i: (i, 0)),       # x tile
            ],
            out_specs=pl.BlockSpec((TILE_R, HW_pad), lambda i: (i, 0)),
        ),
        compiler_params=pltpu.CompilerParams(
            dimension_semantics=("parallel",),   # megacore shards row tiles
        ),
    )(alpha, x2d)

    out2d = out2d[:R, :HW]
    return out2d.reshape(N, C, H, W)


class SmartAverageBoosting:
    """JAX/Pallas port.  __init__ registers exactly one boosting layer."""

    def __init__(self):
        # Deterministic parameter init: one scalar alpha per boosting layer.
        self.layer_alphas = [jnp.array([0.5], dtype=jnp.float32)]

    def __call__(self, x: jax.Array) -> jax.Array:
        # forward: x = layer0(x); then x = x + layer_i(x) for the rest
        # (residual add is fused into the kernel for layers[1:]).
        if self.layer_alphas:
            x = smart_average_layer(x, self.layer_alphas[0], add_residual=False)
        for alpha in self.layer_alphas[1:]:
            x = smart_average_layer(x, alpha, add_residual=True)
        return x


if __name__ == "__main__":
    key = jax.random.PRNGKey(0)
    x = jax.random.normal(key, (2, 4, 16, 16), dtype=jnp.float32)  # NCHW

    model = SmartAverageBoosting()
    out = model(x)
    out = jax.block_until_ready(out)

    # Reference check in plain JAX.
    alpha = model.layer_alphas[0][0]
    ref = alpha * x + (1.0 - alpha) * jnp.mean(x, axis=(2, 3), keepdims=True)
    assert out.shape == x.shape
    assert jnp.allclose(out, ref, atol=1e-5, rtol=1e-5)

    print("KERNEL_OK")
</pallas_src>

<mosaic_0001>
module attributes {stable_mosaic.version = 11 : i64} {
  func.func @_smart_average_kernel(%arg0: i32, %arg1: memref<1xf32, #tpu.memory_space<smem>>, %arg2: memref<8x256xf32, #tpu.memory_space<vmem>>, %arg3: memref<8x256xf32, #tpu.memory_space<vmem>>) attributes {dimension_semantics = [#tpu.dimension_semantics<parallel>], iteration_bounds = array<i64: 1>, scalar_prefetch = 0 : i64, scratch_operands = 0 : i64, tpu.core_type = #tpu.core_type<tc>, window_params = [{transform_indices = @transform_0, window_bounds = array<i64: 1>}, {transform_indices = @transform_1, window_bounds = array<i64: 8, 256>}, {transform_indices = @transform_2, window_bounds = array<i64: 8, 256>}]} {
    %c0 = arith.constant 0 : index
    %c0_0 = arith.constant 0 : index
    %0 = vector.load %arg2[%c0, %c0_0] : memref<8x256xf32, #tpu.memory_space<vmem>>, vector<8x256xf32>
    %cst = arith.constant dense<0.000000e+00> : vector<8xf32>
    %1 = vector.multi_reduction <add>, %0, %cst [1] : vector<8x256xf32> to vector<8xf32>
    %2 = vector.shape_cast %1 : vector<8xf32> to vector<8x1xf32>
    %cst_1 = arith.constant 3.906250e-03 : f32
    %3 = vector.broadcast %cst_1 : f32 to vector<8x1xf32>
    %4 = arith.mulf %2, %3 : vector<8x1xf32>
    %c0_2 = arith.constant 0 : index
    %5 = memref.load %arg1[%c0_2] : memref<1xf32, #tpu.memory_space<smem>>
    %6 = vector.broadcast %4 : vector<8x1xf32> to vector<8x256xf32>
    %7 = arith.subf %0, %6 : vector<8x256xf32>
    %8 = vector.broadcast %5 : f32 to vector<8x256xf32>
    %9 = arith.mulf %8, %7 : vector<8x256xf32>
    %10 = vector.broadcast %4 : vector<8x1xf32> to vector<8x256xf32>
    %11 = arith.addf %10, %9 : vector<8x256xf32>
    %c0_3 = arith.constant 0 : index
    %c0_4 = arith.constant 0 : index
    %12 = vector.load %arg3[%c0_3, %c0_4] : memref<8x256xf32, #tpu.memory_space<vmem>>, vector<8x256xf32>
    tpu.vector_store %arg3[%c0_3, %c0_4], %11 {strides = array<i32>} : memref<8x256xf32, #tpu.memory_space<vmem>>, vector<8x256xf32>,
    return
  }
  func.func @transform_0(%arg0: i32) -> i32 {
    %c0_i32 = arith.constant 0 : i32
    %c0_i32_0 = arith.constant 0 : i32
    return %c0_i32 : i32
  }
  func.func @transform_1(%arg0: i32) -> (i32, i32) {
    %c0_i32 = arith.constant 0 : i32
    %c0_i32_0 = arith.constant 0 : i32
    return %arg0, %c0_i32 : i32, i32
  }
  func.func @transform_2(%arg0: i32) -> (i32, i32) {
    %c0_i32 = arith.constant 0 : i32
    %c0_i32_0 = arith.constant 0 : i32
    return %arg0, %c0_i32 : i32, i32
  }
}

</mosaic_0001>

<bundles_post_ra>
// kernel: tpu_custom_call.1
= control target key start
LH: loop header
LB: loop body
LE: loop exit
PB: predicated region body
PF: predicated region fallthrough
CT: control target
= control target key end

     0   :  { %8 = vsyncpa [#allocation4], 0  ;;  %s140_s0 = inlined_call_operand.<no memory space> [shape: f32[1], index: 0, kind: input, shape index: {}]   ;;  %s141_s1 = inlined_call_operand.hbm [shape: f32[8,256], index: 1, kind: input, shape index: {}]   ;;  %s142_s2 = inlined_call_operand.hbm [shape: f32[8,256], index: 2, kind: output, shape index: {}]  }
   0x1   :  { %9 = vsyncpa [#allocation5], 0  ;;  %s17_s11 = sshll.u32 %s141_s1, 4  ;;  %s114_s12 = smov [#allocation3]   ;;  %s18_s11 = int_to_ptr.hbm [resolvable:$true] %s17_s11 }
   0x2   :  { %s19_s13 = sshll.u32 %s114_s12, 4  ;;  %s20_s13 = int_to_ptr.vmem [resolvable:$true] %s19_s13 }
   0x3   :  { %22 = dma.hbm_to_vmem [thread:$0]  %s18_s11, 256, %s20_s13, [#allocation4]  }
   0x4   :  { %110 = dma.done.wait [#allocation4], 256  }
   0x5   :  { %111 = vsyncadd [#allocation4], 4294967040  ;;  %v27_v0 = vld [vmem:[#allocation3] sm:$0xff]  ;;  %v28_v1 = vld [vmem:[#allocation3 + $0x8] sm:$0xff]  ;;  %v36_v5 = vstv %s140_s0  ;;  %s115_s1 = smov [#allocation6]   ;;  %s50_s19 = sshll.u32 %s142_s2, 4  ;;  %s51_s19 = int_to_ptr.hbm [resolvable:$true] %s50_s19 }
   0x6   :  { %v29_v2 = vadd.f32 %v28_v1, %v27_v0  ;;  %s48_s16 = sshll.u32 %s115_s1, 4  ;;  %s49_s16 = int_to_ptr.vmem [resolvable:$true] %s48_s16 }
   0x8   :  { %30 = vadd.xlane.f32.xlu0 %v29_v2 }
  0x7b   :  { %v31_v3 = vpop.xlane.xlu0 %30 }
  0x7c   :  { %v32_v4 = vmul.f32 0.00390625, %v31_v3 }
  0x7e   :  { %v34_v6 = vsub.f32 %v27_v0, %v32_v4  ;;  %v35_v7 = vsub.f32 %v28_v1, %v32_v4 }
  0x80   :  { %v37_v8 = vmul.f32 %v36_v5, %v34_v6  ;;  %v38_v9 = vmul.f32 %v36_v5, %v35_v7 }
  0x82   :  { %v39_v10 = vadd.f32 %v37_v8, %v32_v4  ;;  %v40_v11 = vadd.f32 %v38_v9, %v32_v4 }
  0x84   :  { %41 = vst [vmem:[#allocation6] sm:$0xff] %v39_v10 }
  0x85   :  { %42 = vst [vmem:[#allocation6 + $0x8] sm:$0xff] %v40_v11 }
  0x86   :  { %53 = dma.vmem_to_hbm [thread:$0]  %s49_s16, 256, %s51_s19, [#allocation5]  }
  0x87   :  { %112 = dma.done.wait [#allocation5], 256  }
  0x88   :  { %113 = vsyncadd [#allocation5], 4294967040 }
  0x89   :  { %58 = vsyncpa [#allocation4], 1 }
  0x8a   :  { %59 = vsyncpa [#allocation5], 1 }

</bundles_post_ra>
